<compile_context>
chip_gen: v6e
topology: v6e:2x2x1
jax: 0.10.0
libtpu: 0.0.40
codegen_flags: <defaults>
</compile_context>

<pallas_src>
from collections import namedtuple

import jax
import jax.numpy as jnp
from jax.experimental import pallas as pl
from jax.experimental.pallas import tpu as pltpu

# ----------------------------------------------------------------------------
# Synthetic genotype (gt.to_dag equivalent): 3 intermediate nodes, 2 edges each.
# normal_concat = [2, 3, 4] -> 3 * C output channels (matches concat_conv1 /
# BertLayerNorm(C * 3) in the original module).
# ----------------------------------------------------------------------------
Genotype = namedtuple("Genotype", ["normal", "normal_concat"])

GENOTYPE = Genotype(
    normal=[
        [("conv1x1", 0), ("skip", 1)],   # node 2
        [("conv1x1", 1), ("skip", 2)],   # node 3
        [("skip", 0), ("conv1x1", 3)],   # node 4
    ],
    normal_concat=[2, 3, 4],
)

LANE = 128
SUBLANE = 8
TM_TARGET = 512   # rows per tile; >=512 rows gets close to the HBM roofline


def _round_up(x, m):
    return (x + m - 1) // m * m


# ----------------------------------------------------------------------------
# Kernel: one lane-dense tile of   out = x @ W_eff + b_eff
# x, W_eff are bf16; accumulation and bias add are f32 (MXU bf16-native path).
# ----------------------------------------------------------------------------
def fused_cell_kernel(x_ref, w_ref, b_ref, o_ref):
    acc = jnp.dot(x_ref[...], w_ref[...], preferred_element_type=jnp.float32)
    o_ref[...] = acc + b_ref[...]


# ----------------------------------------------------------------------------
# Fold preproc0/1 + the (all-affine) DAG + channel concat into (W_eff, b_eff).
# Each DAG state is represented as  state = s0 @ A0 + s1 @ A1 + c.
# ----------------------------------------------------------------------------
def fold_dag_to_affine(params, gene, concat, C_pp, C_p, C):
    z0 = jnp.zeros((C_pp, C), jnp.float32)
    z1 = jnp.zeros((C_p, C), jnp.float32)
    states = [
        (params["w0t"], z1, params["b0"]),   # preproc0(s0)
        (z0, params["w1t"], params["b1"]),   # preproc1(s1)
    ]
    pi = 0
    for edges in gene:
        A0 = jnp.zeros((C_pp, C), jnp.float32)
        A1 = jnp.zeros((C_p, C), jnp.float32)
        c = jnp.zeros((1, C), jnp.float32)
        for op_name, s_idx in edges:
            sA0, sA1, sc = states[s_idx]
            if op_name == "skip":
                A0, A1, c = A0 + sA0, A1 + sA1, c + sc
            elif op_name == "conv1x1":
                wt, b = params["edges"][pi]
                pi += 1
                A0 = A0 + sA0 @ wt
                A1 = A1 + sA1 @ wt
                c = c + sc @ wt + b
            else:
                raise ValueError(f"unknown op {op_name}")
        states.append((A0, A1, c))

    W0 = jnp.concatenate([states[i][0] for i in concat], axis=1)   # [C_pp, 3C]
    W1 = jnp.concatenate([states[i][1] for i in concat], axis=1)   # [C_p,  3C]
    W_eff = jnp.concatenate([W0, W1], axis=0)                      # [C_pp+C_p, 3C]
    b_eff = jnp.concatenate([states[i][2] for i in concat], axis=1)  # [1, 3C]
    return W_eff, b_eff


def init_params(key, C_pp, C_p, C, gene):
    """Deterministic parameter init. Conv weights are stored pre-transposed
    (W^T, shape [C_in, C_out]) so every 1x1 conv is x @ W^T + b."""
    def nxt(k):
        k, sub = jax.random.split(k)
        return k, sub

    params = {}
    key, k = nxt(key); params["w0t"] = 0.1 * jax.random.normal(k, (C_pp, C), jnp.float32)
    key, k = nxt(key); params["b0"] = 0.1 * jax.random.normal(k, (1, C), jnp.float32)
    key, k = nxt(key); params["w1t"] = 0.1 * jax.random.normal(k, (C_p, C), jnp.float32)
    key, k = nxt(key); params["b1"] = 0.1 * jax.random.normal(k, (1, C), jnp.float32)
    # concat_conv1 params exist in the module's __init__ (kept for fidelity) but
    # its forward result is discarded, so the kernel never computes it.
    key, k = nxt(key); params["wct"] = 0.1 * jax.random.normal(k, (C_p, 3 * C), jnp.float32)
    key, k = nxt(key); params["bct"] = 0.1 * jax.random.normal(k, (1, 3 * C), jnp.float32)

    edges = []
    for node_edges in gene:
        for op_name, _ in node_edges:
            if op_name == "conv1x1":
                key, k = nxt(key); wt = 0.1 * jax.random.normal(k, (C, C), jnp.float32)
                key, k = nxt(key); b = 0.1 * jax.random.normal(k, (1, C), jnp.float32)
                edges.append((wt, b))
    params["edges"] = edges
    return params


def augment_cell_forward(s0_ncl, s1_ncl, params, gene, concat):
    """Pallas-backed forward. s0_ncl: [N, C_pp, L], s1_ncl: [N, C_p, L].
    Returns s_out: [N, len(concat)*C, L] (same layout as the PyTorch module)."""
    N, C_pp, L = s0_ncl.shape
    _, C_p, _ = s1_ncl.shape
    C = params["b0"].shape[-1]
    C_out = C * len(concat)
    M = N * L
    K = C_pp + C_p

    # Fold the affine DAG into a single (W_eff, b_eff) -- tiny matmuls.
    W_eff, b_eff = fold_dag_to_affine(params, gene, concat, C_pp, C_p, C)

    # NCL -> channels-last [M, K] (channels on the lane axis).
    s_cat = jnp.concatenate(
        [jnp.transpose(s0_ncl, (0, 2, 1)).reshape(M, C_pp),
         jnp.transpose(s1_ncl, (0, 2, 1)).reshape(M, C_p)], axis=1)

    # Pad to lane/sublane-aligned shapes; bf16 activations/weights, f32 bias.
    K_pad = _round_up(K, LANE)
    Nout_pad = _round_up(C_out, LANE)
    TM = TM_TARGET if M > TM_TARGET else _round_up(M, SUBLANE)
    M_pad = _round_up(M, TM)
    grid_m = M_pad // TM

    x = jnp.zeros((M_pad, K_pad), jnp.bfloat16).at[:M, :K].set(
        s_cat.astype(jnp.bfloat16))
    w = jnp.zeros((K_pad, Nout_pad), jnp.bfloat16).at[:K, :C_out].set(
        W_eff.astype(jnp.bfloat16))
    b = jnp.zeros((1, Nout_pad), jnp.float32).at[:, :C_out].set(b_eff)

    # VMEM working set: double-buffered x/out tiles + (also 2-buffered) w/b,
    # plus ~1 MiB slack.  Clamp well under v7x's 64 MiB physical VMEM.
    vmem_bytes = (2 * (TM * K_pad * 2 + TM * Nout_pad * 4)
                  + 2 * (K_pad * Nout_pad * 2 + Nout_pad * 4)
                  + (1 << 20))
    vmem_limit = int(min(max(vmem_bytes, 4 << 20), 48 << 20))

    cost = pl.CostEstimate(
        flops=2 * M_pad * K_pad * Nout_pad,
        transcendentals=0,
        bytes_accessed=(M_pad * K_pad * 2 + K_pad * Nout_pad * 2
                        + Nout_pad * 4 + M_pad * Nout_pad * 4),
    )

    out_pad = pl.pallas_call(
        fused_cell_kernel,
        out_shape=jax.ShapeDtypeStruct((M_pad, Nout_pad), jnp.float32),
        grid_spec=pltpu.PrefetchScalarGridSpec(
            num_scalar_prefetch=0,
            grid=(grid_m,),
            in_specs=[
                pl.BlockSpec((TM, K_pad), lambda i: (i, 0)),        # activations: tiled over M
                pl.BlockSpec((K_pad, Nout_pad), lambda i: (0, 0)),  # W_eff: resident
                pl.BlockSpec((1, Nout_pad), lambda i: (0, 0)),      # b_eff: resident
            ],
            out_specs=pl.BlockSpec((TM, Nout_pad), lambda i: (i, 0)),
        ),
        compiler_params=pltpu.CompilerParams(
            dimension_semantics=("parallel",),   # megacore sharding on v7x
            vmem_limit_bytes=vmem_limit,
        ),
        cost_estimate=cost,
    )(x, w, b)

    # Strip padding; return NCL to match the PyTorch module's output layout.
    # TODO(synk): keeping the output channels-last (N, L, 3C) would save this
    # extra transpose pass if the downstream consumer allowed it.
    out = out_pad[:M, :C_out].reshape(N, L, C_out)
    return jnp.transpose(out, (0, 2, 1))


def reference_forward(s0, s1, params, gene, concat):
    """Pure-JAX f32 reference matching the PyTorch forward (NCL layout)."""
    def conv1x1(x, wt, b):  # x: [N, C_in, L], wt: [C_in, C_out]
        return jnp.einsum("ncl,co->nol", x, wt) + b.reshape(1, -1, 1)

    _ = conv1x1(s1, params["wct"], params["bct"])  # concat_conv1: computed then discarded
    x0 = conv1x1(s0, params["w0t"], params["b0"])
    x1 = conv1x1(s1, params["w1t"], params["b1"])
    states = [x0, x1]
    pi = 0
    for edges in gene:
        s_cur = 0.0
        for op_name, s_idx in edges:
            src = states[s_idx]
            if op_name == "skip":
                val = src
            else:
                wt, b = params["edges"][pi]; pi += 1
                val = conv1x1(src, wt, b)
            s_cur = s_cur + val
        states.append(s_cur)
    return jnp.concatenate([states[i] for i in concat], axis=1)


if __name__ == "__main__":
    # Small shapes consistent with the module: Conv1d -> NCL inputs.
    N, C_pp, C_p, C, L = 2, 8, 8, 8, 16

    key = jax.random.PRNGKey(0)
    k_s0, k_s1, k_params = jax.random.split(key, 3)
    s0 = jax.random.normal(k_s0, (N, C_pp, L), jnp.float32)
    s1 = jax.random.normal(k_s1, (N, C_p, L), jnp.float32)

    params = init_params(k_params, C_pp, C_p, C, GENOTYPE.normal)

    # TODO(synk): self.batch_norm (BertLayerNorm) is constructed in __init__
    # but never applied in forward(), so it is intentionally omitted here.

    out = augment_cell_forward(s0, s1, params, GENOTYPE.normal, GENOTYPE.normal_concat)
    out = jax.block_until_ready(out)

    ref = reference_forward(s0, s1, params, GENOTYPE.normal, GENOTYPE.normal_concat)
    assert out.shape == (N, C * len(GENOTYPE.normal_concat), L), out.shape
    # bf16 MXU inputs with f32 accumulation vs. f32 reference -> allow ~1e-2 error.
    max_err = float(jnp.max(jnp.abs(out - ref)))
    assert jnp.allclose(out, ref, atol=2e-2, rtol=2e-2), max_err

    print("KERNEL_OK")
</pallas_src>

<mosaic_0001>
module attributes {stable_mosaic.version = 11 : i64} {
  func.func @fused_cell_kernel(%arg0: i32, %arg1: memref<32x128xbf16, #tpu.memory_space<vmem>>, %arg2: memref<128x128xbf16, #tpu.memory_space<vmem>>, %arg3: memref<1x128xf32, #tpu.memory_space<vmem>>, %arg4: memref<32x128xf32, #tpu.memory_space<vmem>>) attributes {dimension_semantics = [#tpu.dimension_semantics<parallel>], iteration_bounds = array<i64: 1>, scalar_prefetch = 0 : i64, scratch_operands = 0 : i64, tpu.core_type = #tpu.core_type<tc>, window_params = [{transform_indices = @transform_0, window_bounds = array<i64: 32, 128>}, {pipeline_mode = #tpu.pipeline_mode<synchronous>, transform_indices = @transform_1, window_bounds = array<i64: 128, 128>}, {pipeline_mode = #tpu.pipeline_mode<synchronous>, transform_indices = @transform_2, window_bounds = array<i64: 1, 128>}, {transform_indices = @transform_3, window_bounds = array<i64: 32, 128>}]} {
    %c0 = arith.constant 0 : index
    %c0_0 = arith.constant 0 : index
    %0 = vector.load %arg1[%c0, %c0_0] : memref<32x128xbf16, #tpu.memory_space<vmem>>, vector<32x128xbf16>
    %c0_1 = arith.constant 0 : index
    %c0_2 = arith.constant 0 : index
    %1 = vector.load %arg2[%c0_1, %c0_2] : memref<128x128xbf16, #tpu.memory_space<vmem>>, vector<128x128xbf16>
    %cst = arith.constant dense<0.000000e+00> : vector<32x128xf32>
    %2 = tpu.matmul %0, %1, %cst {dimension_numbers = #tpu.dot_dimension_numbers<[1], [0], [0], [1], [0, 0, 1, 1], [], []>} : vector<32x128xbf16>, vector<128x128xbf16>, vector<32x128xf32> -> vector<32x128xf32>
    %c0_3 = arith.constant 0 : index
    %c0_4 = arith.constant 0 : index
    %3 = vector.load %arg3[%c0_3, %c0_4] : memref<1x128xf32, #tpu.memory_space<vmem>>, vector<1x128xf32>
    %4 = vector.broadcast %3 : vector<1x128xf32> to vector<32x128xf32>
    %5 = arith.addf %2, %4 : vector<32x128xf32>
    %c0_5 = arith.constant 0 : index
    %c0_6 = arith.constant 0 : index
    %6 = vector.load %arg4[%c0_5, %c0_6] : memref<32x128xf32, #tpu.memory_space<vmem>>, vector<32x128xf32>
    tpu.vector_store %arg4[%c0_5, %c0_6], %5 {strides = array<i32>} : memref<32x128xf32, #tpu.memory_space<vmem>>, vector<32x128xf32>,
    return
  }
  func.func @transform_0(%arg0: i32) -> (i32, i32) {
    %c0_i32 = arith.constant 0 : i32
    %c0_i32_0 = arith.constant 0 : i32
    return %arg0, %c0_i32 : i32, i32
  }
  func.func @transform_1(%arg0: i32) -> (i32, i32) {
    %c0_i32 = arith.constant 0 : i32
    %c0_i32_0 = arith.constant 0 : i32
    %c0_i32_1 = arith.constant 0 : i32
    return %c0_i32, %c0_i32_0 : i32, i32
  }
  func.func @transform_2(%arg0: i32) -> (i32, i32) {
    %c0_i32 = arith.constant 0 : i32
    %c0_i32_0 = arith.constant 0 : i32
    %c0_i32_1 = arith.constant 0 : i32
    return %c0_i32, %c0_i32_0 : i32, i32
  }
  func.func @transform_3(%arg0: i32) -> (i32, i32) {
    %c0_i32 = arith.constant 0 : i32
    %c0_i32_0 = arith.constant 0 : i32
    return %arg0, %c0_i32 : i32, i32
  }
}

</mosaic_0001>

<bundles_post_ra>
// kernel: tpu_custom_call.1
= control target key start
LH: loop header
LB: loop body
LE: loop exit
PB: predicated region body
PF: predicated region fallthrough
CT: control target
= control target key end

     0   :  { %8 = vsyncpa [#allocation3], 0  ;;  %s365_s0 = inlined_call_operand.hbm [shape: bf16[32,128], index: 0, kind: input, shape index: {}]   ;;  %s366_s1 = inlined_call_operand.hbm [shape: bf16[128,128], index: 1, kind: input, shape index: {}]   ;;  %s367_s2 = inlined_call_operand.vmem [shape: f32[1,128], index: 2, kind: input, shape index: {}]   ;;  %s368_s3 = inlined_call_operand.hbm [shape: f32[32,128], index: 3, kind: output, shape index: {}]  }
   0x1   :  { %9 = vsyncpa [#allocation6], 0 }
   0x2   :  { %10 = vsyncpa [#allocation4], 0  ;;  %s326_s12 = smov [#allocation2]  }
   0x3   :  { %s16_s13 = sshll.u32 %s326_s12, 4  ;;  %s17_s13 = int_to_ptr.vmem [resolvable:$true] %s16_s13 }
   0x4   :  { %s268_s14 = scalar_lea.vmem %s17_s13, 256  ;;  %p273_p1 = scmp.lt.s32.totalorder %s17_s13, %s17_s13 }
   0x5   :  { %p269_p0 = scmp.ne.s32.totalorder %s17_s13, %s268_s14  ;;  %p274_p2 = scmp.lt.s32.totalorder %s268_s14, %s268_s14 }
   0x7   :  { %p275_p3 = por %p274_p2, %p273_p1 }
   0x9   :  { %p276_p4 = pnand %p275_p3, %p269_p0 }
   0xb   :  { %279 = shalt.err (!%p276_p4)
}
   0xc   :  { %s327_s15 = smov 64   ;;  %s328_s16 = smov 4  }
   0xd   :  { %22 = dma.hbm_to_vmem [thread:$0]  %s365_s0, 256, %s17_s13, [#allocation3], %s327_s15, %s327_s15, %s328_s16  }
   0xe   :  { %s329_s19 = smov [#allocation5]  }
   0xf   :  { %s28_s20 = sshll.u32 %s329_s19, 4  ;;  %s29_s20 = int_to_ptr.vmem [resolvable:$true] %s28_s20 }
  0x10   :  { %s288_s21 = scalar_lea.vmem %s29_s20, 1024  ;;  %p293_p6 = scmp.lt.s32.totalorder %s29_s20, %s29_s20 }
  0x11   :  { %p289_p5 = scmp.ne.s32.totalorder %s29_s20, %s288_s21  ;;  %p294_p7 = scmp.lt.s32.totalorder %s288_s21, %s288_s21 }
  0x13   :  { %p295_p8 = por %p294_p7, %p293_p6 }
  0x15   :  { %p296_p9 = pnand %p295_p8, %p289_p5 }
  0x17   :  { %299 = shalt.err (!%p296_p9)
}
  0x18   :  { %34 = dma.hbm_to_vmem [thread:$0]  %s366_s1, 1024, %s29_s20, [#allocation6], %s327_s15, %s327_s15, %s328_s16  }
  0x19   :  { %320 = dma.done.wait [#allocation3], 256  }
  0x1a   :  { %321 = vsyncadd [#allocation3], 4294967040 }
  0x1b   :  { %322 = dma.done.wait [#allocation6], 1024  }
  0x1c   :  { %323 = vsyncadd [#allocation6], 4294966272  ;;  %v250_v0 = vld [vmem:[#allocation5 + $0x38] sm:$0xff]   ;;  %v251_v1 = vld [vmem:[#allocation5 + $0x30] sm:$0xff]   ;;  %s330_s24 = smov [#allocation7]  }
  0x1d   :  { %223 = vmatprep.subr.bf16.mxu0 %v250_v0  ;;  %v252_v2 = vld [vmem:[#allocation5 + $0x28] sm:$0xff]   ;;  %v253_v3 = vld [vmem:[#allocation5 + $0x20] sm:$0xff]   ;;  %v258_v4 = vld [vmem:[#allocation2] sm:$0xff]   ;;  %s189_s25 = sshll.u32 %s330_s24, 4  ;;  %s190_s25 = int_to_ptr.vmem [resolvable:$true] %s189_s25 }
  0x1e   :  { %224 = vmatpush3.bf16.msra.mxu0 %v250_v0  ;;  %239 = vmatprep.mubr.bf16.mxu0 %v258_v4  ;;  %v254_v5 = vld [vmem:[#allocation5 + $0x18] sm:$0xff]   ;;  %v255_v6 = vld [vmem:[#allocation5 + $0x10] sm:$0xff]   ;;  %v256_v7 = vld [vmem:[#allocation5 + $0x8] sm:$0xff]   ;;  %s300_s26 = scalar_lea.vmem %s190_s25, 512  ;;  %p305_p11 = scmp.lt.s32.totalorder %s190_s25, %s190_s25 }
  0x1f   :  { %225 = vmatprep.subr.bf16.mxu0 %v251_v1  ;;  %v257_v8 = vld [vmem:[#allocation5] sm:$0xff]   ;;  %v259_v9 = vld [vmem:[#allocation2 + $0x8] sm:$0xff]   ;;  %v202_v10 = vld [vmem:[%s367_s2] ss:$0 sm:$0xff]  ;;  %p301_p10 = scmp.ne.s32.totalorder %s190_s25, %s300_s26  ;;  %p306_p12 = scmp.lt.s32.totalorder %s300_s26, %s300_s26 }
  0x21   :  { %p307_p13 = por %p306_p12, %p305_p11 }
  0x22   :  { %226 = vmatpush3.bf16.msra.mxu0 %v251_v1 }
  0x23   :  { %227 = vmatprep.subr.bf16.mxu0 %v252_v2  ;;  %p308_p0 = pnand %p307_p13, %p301_p10 }
  0x26   :  { %228 = vmatpush3.bf16.msra.mxu0 %v252_v2 }
  0x27   :  { %229 = vmatprep.subr.bf16.mxu0 %v253_v3 }
  0x2a   :  { %230 = vmatpush3.bf16.msra.mxu0 %v253_v3 }
  0x2b   :  { %231 = vmatprep.subr.bf16.mxu0 %v254_v5 }
  0x2e   :  { %232 = vmatpush3.bf16.msra.mxu0 %v254_v5 }
  0x2f   :  { %233 = vmatprep.subr.bf16.mxu0 %v255_v6 }
  0x32   :  { %234 = vmatpush3.bf16.msra.mxu0 %v255_v6 }
  0x33   :  { %235 = vmatprep.subr.bf16.mxu0 %v256_v7 }
  0x36   :  { %236 = vmatpush3.bf16.msra.mxu0 %v256_v7 }
  0x37   :  { %237 = vmatprep.subr.bf16.mxu0 %v257_v8 }
  0x3a   :  { %238 = vmatpush3.bf16.msra.mxu0 %v257_v8 }
  0x3d   :  { %240 = vmatmul.mubr.bf16.vlgmr.msra.gmra.mxu0 %v259_v9 }
  0xfd   :  { %v241_v11 = vpop.f32.mrf.mxu0 }
  0xfe   :  { %v174_v12 = vadd.f32 %v241_v11, %v202_v10 }
  0xff   :  { %v165_v13 = vpop.f32.mrf.mxu0 }
 0x100   :  { %182 = vst [vmem:[#allocation7 + $0x10] sm:$0xff] %v174_v12  ;;  %v166_v14 = vadd.f32 %v202_v10, %v165_v13 }
 0x101   :  { %v242_v15 = vpop.f32.mrf.mxu0 }
 0x102   :  { %180 = vst [vmem:[#allocation7] sm:$0xff] %v166_v14  ;;  %v177_v16 = vadd.f32 %v242_v15, %v202_v10 }
 0x103   :  { %v168_v17 = vpop.f32.mrf.mxu0 }
 0x104   :  { %183 = vst [vmem:[#allocation7 + $0x18] sm:$0xff] %v177_v16  ;;  %v169_v18 = vadd.f32 %v202_v10, %v168_v17 }
 0x106   :  { %181 = vst [vmem:[#allocation7 + $0x8] sm:$0xff] %v169_v18 }
 0x107   :  { %311 = shalt.err (!%p308_p0)
}
 0x108   :  { %s331_s2 = smov 128   ;;  %s332_s27 = smov 8  }
 0x109   :  { %195 = dma.vmem_to_hbm [thread:$0]  %s190_s25, 512, %s368_s3, [#allocation4], %s331_s2, %s331_s2, %s332_s27  }
 0x10a   :  { %324 = dma.done.wait [#allocation4], 512  }
 0x10b   :  { %325 = vsyncadd [#allocation4], 4294966784 }
 0x10c   :  { %199 = vsyncpa [#allocation3], 1 }
 0x10d   :  { %200 = vsyncpa [#allocation6], 1 }
 0x10e   :  { %201 = vsyncpa [#allocation4], 1 }

</bundles_post_ra>
